<compile_context>
chip_gen: v7x
topology: tpu7x:2x2x1
jax: 0.10.0
libtpu: 0.0.40
codegen_flags: <defaults>
</compile_context>

<pallas_src>
import functools

import jax
import jax.numpy as jnp
from jax import lax
from jax.experimental import pallas as pl
from jax.experimental.pallas import tpu as pltpu


def _round_up(x, m):
    return (x + m - 1) // m * m


def _vmem_capacity_bytes():
    """Per-core VMEM capacity in bytes; conservative fallback if unavailable."""
    try:
        info = pltpu.get_tpu_info()
        cap = getattr(info, "vmem_capacity_bytes", None)
        if cap:
            return int(cap)
    except Exception:
        pass
    return 64 * 1024 * 1024  # v7x per-TC size: safe lower bound everywhere


def _ls_ce_kernel(preds_ref, tgt_ref, sum_out, nll_out, cnt_out, *, ignore_index):
    # grid = (parallel chunk p, sequential row-tile i); the (1,1,1) output blocks
    # are resident across the "arbitrary" i axis and used directly as accumulators.
    i = pl.program_id(1)

    @pl.when(i == 0)
    def _():
        sum_out[...] = jnp.zeros_like(sum_out)
        nll_out[...] = jnp.zeros_like(nll_out)
        cnt_out[...] = jnp.zeros_like(cnt_out)

    x = preds_ref[...]                                   # (TM, C), input dtype
    tgt = tgt_ref[...]                                   # (TM, 1), int32
    num_classes = x.shape[-1]
    col = lax.broadcasted_iota(jnp.int32, x.shape, 1)    # (TM, C)

    # max and the one-hot gather of the target logit stay in the input dtype
    # (exact for bf16); the wide reductions accumulate in f32.  Each (TM, C)
    # intermediate below feeds exactly ONE reduction, so no shared full-block
    # f32 temporary (the old `shifted`) has to be materialized in VMEM.
    m = jnp.max(x, axis=-1, keepdims=True).astype(jnp.float32)           # (TM, 1)
    picked = jnp.sum(jnp.where(col == tgt, x, jnp.zeros_like(x)),
                     axis=-1, keepdims=True, dtype=jnp.float32)          # (TM, 1)
    sum_x = jnp.sum(x, axis=-1, keepdims=True, dtype=jnp.float32)        # (TM, 1)
    lse = m + jnp.log(jnp.sum(jnp.exp(x.astype(jnp.float32) - m),
                              axis=-1, keepdims=True))                   # (TM, 1)

    row_neg_sum = num_classes * lse - sum_x       # -sum_c log_softmax(x)_c per row
    neg_logp_t = lse - picked                     # -log_softmax(x)[target] per row
    valid = (tgt != ignore_index).astype(jnp.float32)

    # one scalar per accumulator per step (no lane-sparse (TM,1) scratch traffic)
    sum_out[...] += jnp.sum(row_neg_sum)
    nll_out[...] += jnp.sum(valid * neg_logp_t)
    cnt_out[...] += jnp.sum(valid)    # f32 count: exact up to 2^24 valid rows/chunk


def label_smoothing_cross_entropy(preds, target, *, epsilon=0.1,
                                  reduction="mean", ignore_index=-100,
                                  block_rows=None, num_parallel=None,
                                  vmem_limit_bytes=None):
    """Pallas TPU implementation of LabelSmoothingCrossEntropy.forward."""
    preds = jnp.asarray(preds)
    if preds.dtype not in (jnp.float32, jnp.bfloat16):
        preds = preds.astype(jnp.float32)
    target = jnp.asarray(target, dtype=jnp.int32).reshape(-1, 1)
    N, C = preds.shape

    itemsize = jnp.dtype(preds.dtype).itemsize
    sublane = 8 * (4 // itemsize)              # 8 rows for f32, 16 for bf16 packing

    # generation-aware VMEM sizing: big blocks on 128 MiB parts (v5e/v6e),
    # smaller blocks + lower limit on v7x (64 MiB per TensorCore)
    vmem_cap = _vmem_capacity_bytes()
    big_vmem = vmem_cap >= 96 * 1024 * 1024
    block_budget = (16 if big_vmem else 4) * 1024 * 1024
    if vmem_limit_bytes is None:
        vmem_limit_bytes = min(int(vmem_cap * 3 // 4), 96 * 1024 * 1024)

    if block_rows is None:
        br = block_budget // max(1, C * itemsize)
        br = max(sublane, min(br, 8192))           # byte-sized tile, 8192-row ceiling
        br = min(br, _round_up(N, sublane))
        block_rows = max(sublane, (br // sublane) * sublane)
    else:
        block_rows = max(sublane, _round_up(block_rows, sublane))
    # TODO(synk): for vocab-scale C where even a sublane-high tile exceeds VMEM, a
    # class-tiled inner grid axis with an online logsumexp is needed.

    tiles_total = pl.cdiv(N, block_rows)
    if num_parallel is None:
        num_parallel = 2 if tiles_total >= 2 else 1    # both TensorCores on v7x
    num_parallel = max(1, min(num_parallel, tiles_total))
    tiles_per_chunk = pl.cdiv(tiles_total, num_parallel)
    padded_N = num_parallel * tiles_per_chunk * block_rows
    n_pad = padded_N - N

    if n_pad:
        preds = jnp.pad(preds, ((0, n_pad), (0, 0)))
        target = jnp.pad(target, ((0, n_pad), (0, 0)),
                         constant_values=ignore_index)

    kernel = functools.partial(_ls_ce_kernel, ignore_index=ignore_index)

    out_shapes = tuple(jax.ShapeDtypeStruct((num_parallel, 1, 1), jnp.float32)
                       for _ in range(3))

    row_block = lambda p, i: (p * tiles_per_chunk + i, 0)
    part_block = lambda p, i: (p, 0, 0)

    sum_parts, nll_parts, cnt_parts = pl.pallas_call(
        kernel,
        out_shape=out_shapes,
        grid_spec=pltpu.PrefetchScalarGridSpec(
            num_scalar_prefetch=0,
            grid=(num_parallel, tiles_per_chunk),
            in_specs=[
                pl.BlockSpec((block_rows, C), row_block),
                pl.BlockSpec((block_rows, 1), row_block),
            ],
            out_specs=[
                pl.BlockSpec((1, 1, 1), part_block),
                pl.BlockSpec((1, 1, 1), part_block),
                pl.BlockSpec((1, 1, 1), part_block),
            ],
        ),
        compiler_params=pltpu.CompilerParams(
            dimension_semantics=("parallel", "arbitrary"),
            vmem_limit_bytes=vmem_limit_bytes,
        ),
    )(preds, target)

    total_sum = jnp.sum(sum_parts)
    total_nll = jnp.sum(nll_parts)
    count = jnp.sum(cnt_parts)

    if n_pad:
        # padded rows are all-zero logits -> each contributes exactly C*log(C) to
        # the smoothing sum; remove it in closed form instead of masking in-kernel
        total_sum = total_sum - jnp.float32(n_pad) * (C * jnp.log(jnp.float32(C)))

    if reduction == "mean":
        loss = total_sum / N
        nll = total_nll / count   # NaN if every row is ignored (matches torch nll_loss)
    elif reduction == "sum":
        loss = total_sum
        nll = total_nll
    else:
        # TODO(synk): reduction='none' needs per-row outputs; only reduced paths here.
        raise NotImplementedError("only 'mean' and 'sum' reductions are implemented")

    return epsilon * (loss / C) + (1.0 - epsilon) * nll


def _reference(preds, target, *, epsilon=0.1, ignore_index=-100, reduction="mean"):
    """Pure-JAX reference of the PyTorch forward."""
    preds = jnp.asarray(preds, jnp.float32)
    target = jnp.asarray(target, jnp.int32)
    n = preds.shape[-1]
    logp = jax.nn.log_softmax(preds, axis=-1)
    row_loss = -jnp.sum(logp, axis=-1)
    valid = target != ignore_index
    safe_t = jnp.where(valid, target, 0)
    picked = jnp.take_along_axis(logp, safe_t[:, None], axis=-1)[:, 0]
    nll_terms = jnp.where(valid, -picked, 0.0)
    if reduction == "mean":
        loss = jnp.mean(row_loss)
        nll = jnp.sum(nll_terms) / jnp.sum(valid)
    else:
        loss = jnp.sum(row_loss)
        nll = jnp.sum(nll_terms)
    return epsilon * (loss / n) + (1.0 - epsilon) * nll


if __name__ == "__main__":
    key = jax.random.PRNGKey(0)
    k1, k2, k3, k4, k5, k6 = jax.random.split(key, 6)

    # case 1: small single-tile f32 problem; mean and sum reductions
    N, C = 16, 32
    preds = jax.random.normal(k1, (N, C), dtype=jnp.float32)
    target = jax.random.randint(k2, (N,), 0, C, dtype=jnp.int32)
    target = target.at[3].set(-100).at[11].set(-100)   # exercise ignore_index
    out = jax.block_until_ready(
        label_smoothing_cross_entropy(preds, target, epsilon=0.1))
    ref = _reference(preds, target, epsilon=0.1)
    assert jnp.allclose(out, ref, rtol=1e-5, atol=1e-5), (out, ref)

    out_s = jax.block_until_ready(
        label_smoothing_cross_entropy(preds, target, epsilon=0.1, reduction="sum"))
    ref_s = _reference(preds, target, epsilon=0.1, reduction="sum")
    assert jnp.allclose(out_s, ref_s, rtol=1e-5, atol=1e-3), (out_s, ref_s)

    # case 2: non-divisible N + forced small tile -> exercises the
    # (parallel, arbitrary) grid, the padding correction and output accumulators
    N2, C2 = 50, 32
    preds2 = jax.random.normal(k3, (N2, C2), dtype=jnp.float32)
    target2 = jax.random.randint(k4, (N2,), 0, C2, dtype=jnp.int32)
    target2 = target2.at[0].set(-100).at[17].set(-100).at[49].set(-100)
    out2 = jax.block_until_ready(
        label_smoothing_cross_entropy(preds2, target2, epsilon=0.1, block_rows=8))
    ref2 = _reference(preds2, target2, epsilon=0.1)
    assert jnp.allclose(out2, ref2, rtol=1e-5, atol=1e-5), (out2, ref2)

    # case 3: bf16 logits stay bf16 in HBM/VMEM (in-kernel widening), with padding
    N3, C3 = 40, 128
    preds3 = jax.random.normal(k5, (N3, C3), dtype=jnp.float32).astype(jnp.bfloat16)
    target3 = jax.random.randint(k6, (N3,), 0, C3, dtype=jnp.int32)
    target3 = target3.at[7].set(-100)
    out3 = jax.block_until_ready(
        label_smoothing_cross_entropy(preds3, target3, epsilon=0.1))
    ref3 = _reference(preds3.astype(jnp.float32), target3, epsilon=0.1)
    assert jnp.allclose(out3, ref3, rtol=1e-4, atol=1e-4), (out3, ref3)

    print("KERNEL_OK")
</pallas_src>

<mosaic_0001>
module attributes {stable_mosaic.version = 11 : i64} {
  func.func @_ls_ce_kernel(%arg0: i32, %arg1: i32, %arg2: memref<16x32xf32, #tpu.memory_space<vmem>>, %arg3: memref<16x1xi32, #tpu.memory_space<vmem>>, %arg4: memref<1x1x1xf32, #tpu.memory_space<vmem>>, %arg5: memref<1x1x1xf32, #tpu.memory_space<vmem>>, %arg6: memref<1x1x1xf32, #tpu.memory_space<vmem>>) attributes {dimension_semantics = [#tpu.dimension_semantics<parallel>, #tpu.dimension_semantics<arbitrary>], iteration_bounds = array<i64: 1, 1>, scalar_prefetch = 0 : i64, scratch_operands = 0 : i64, tpu.core_type = #tpu.core_type<tc>, window_params = [{transform_indices = @transform_0, window_bounds = array<i64: 16, 32>}, {transform_indices = @transform_1, window_bounds = array<i64: 16, 1>}, {transform_indices = @transform_2, window_bounds = array<i64: 1, 1, 1>}, {transform_indices = @transform_3, window_bounds = array<i64: 1, 1, 1>}, {transform_indices = @transform_4, window_bounds = array<i64: 1, 1, 1>}]} {
    %c0_i32 = arith.constant 0 : i32
    %0 = arith.cmpi eq, %arg1, %c0_i32 : i32
    %1 = arith.extui %0 : i1 to i32
    %c0_i32_0 = arith.constant 0 : i32
    %2 = arith.cmpi ne, %1, %c0_i32_0 : i32
    scf.if %2 {
      %cst_30 = arith.constant 0.000000e+00 : f32
      %56 = vector.broadcast %cst_30 : f32 to vector<1x1x1xf32>
      %c0_31 = arith.constant 0 : index
      %c0_32 = arith.constant 0 : index
      %c0_33 = arith.constant 0 : index
      %57 = vector.load %arg4[%c0_31, %c0_32, %c0_33] : memref<1x1x1xf32, #tpu.memory_space<vmem>>, vector<1x1x1xf32>
      tpu.vector_store %arg4[%c0_31, %c0_32, %c0_33], %56 {strides = array<i32>} : memref<1x1x1xf32, #tpu.memory_space<vmem>>, vector<1x1x1xf32>,
      %cst_34 = arith.constant 0.000000e+00 : f32
      %58 = vector.broadcast %cst_34 : f32 to vector<1x1x1xf32>
      %c0_35 = arith.constant 0 : index
      %c0_36 = arith.constant 0 : index
      %c0_37 = arith.constant 0 : index
      %59 = vector.load %arg5[%c0_35, %c0_36, %c0_37] : memref<1x1x1xf32, #tpu.memory_space<vmem>>, vector<1x1x1xf32>
      tpu.vector_store %arg5[%c0_35, %c0_36, %c0_37], %58 {strides = array<i32>} : memref<1x1x1xf32, #tpu.memory_space<vmem>>, vector<1x1x1xf32>,
      %cst_38 = arith.constant 0.000000e+00 : f32
      %60 = vector.broadcast %cst_38 : f32 to vector<1x1x1xf32>
      %c0_39 = arith.constant 0 : index
      %c0_40 = arith.constant 0 : index
      %c0_41 = arith.constant 0 : index
      %61 = vector.load %arg6[%c0_39, %c0_40, %c0_41] : memref<1x1x1xf32, #tpu.memory_space<vmem>>, vector<1x1x1xf32>
      tpu.vector_store %arg6[%c0_39, %c0_40, %c0_41], %60 {strides = array<i32>} : memref<1x1x1xf32, #tpu.memory_space<vmem>>, vector<1x1x1xf32>,
    } else {
    }
    %c0 = arith.constant 0 : index
    %c0_1 = arith.constant 0 : index
    %3 = vector.load %arg2[%c0, %c0_1] : memref<16x32xf32, #tpu.memory_space<vmem>>, vector<16x32xf32>
    %c0_2 = arith.constant 0 : index
    %c0_3 = arith.constant 0 : index
    %4 = vector.load %arg3[%c0_2, %c0_3] : memref<16x1xi32, #tpu.memory_space<vmem>>, vector<16x1xi32>
    %5 = tpu.iota {dimensions = array<i32: 1>} : vector<16x32xi32>
    %cst = arith.constant dense<0xFF800000> : vector<16xf32>
    %6 = vector.multi_reduction <maximumf>, %3, %cst [1] : vector<16x32xf32> to vector<16xf32>
    %7 = vector.shape_cast %6 : vector<16xf32> to vector<16x1xf32>
    %8 = vector.broadcast %4 : vector<16x1xi32> to vector<16x32xi32>
    %9 = arith.cmpi eq, %5, %8 : vector<16x32xi32>
    %cst_4 = arith.constant 0.000000e+00 : f32
    %10 = vector.broadcast %cst_4 : f32 to vector<16x32xf32>
    %11 = arith.select %9, %3, %10 : vector<16x32xi1>, vector<16x32xf32>
    %cst_5 = arith.constant dense<0.000000e+00> : vector<16xf32>
    %12 = vector.multi_reduction <add>, %11, %cst_5 [1] : vector<16x32xf32> to vector<16xf32>
    %13 = vector.shape_cast %12 : vector<16xf32> to vector<16x1xf32>
    %cst_6 = arith.constant dense<0.000000e+00> : vector<16xf32>
    %14 = vector.multi_reduction <add>, %3, %cst_6 [1] : vector<16x32xf32> to vector<16xf32>
    %15 = vector.shape_cast %14 : vector<16xf32> to vector<16x1xf32>
    %16 = vector.broadcast %7 : vector<16x1xf32> to vector<16x32xf32>
    %17 = arith.subf %3, %16 : vector<16x32xf32>
    %18 = math.exp %17 : vector<16x32xf32>
    %cst_7 = arith.constant dense<0.000000e+00> : vector<16xf32>
    %19 = vector.multi_reduction <add>, %18, %cst_7 [1] : vector<16x32xf32> to vector<16xf32>
    %20 = vector.shape_cast %19 : vector<16xf32> to vector<16x1xf32>
    %21 = math.log %20 : vector<16x1xf32>
    %22 = arith.addf %7, %21 : vector<16x1xf32>
    %cst_8 = arith.constant 3.200000e+01 : f32
    %23 = vector.broadcast %cst_8 : f32 to vector<16x1xf32>
    %24 = arith.mulf %23, %22 : vector<16x1xf32>
    %25 = arith.subf %24, %15 : vector<16x1xf32>
    %26 = arith.subf %22, %13 : vector<16x1xf32>
    %c-100_i32 = arith.constant -100 : i32
    %27 = vector.broadcast %c-100_i32 : i32 to vector<16x1xi32>
    %28 = arith.cmpi ne, %4, %27 : vector<16x1xi32>
    %29 = arith.extui %28 : vector<16x1xi1> to vector<16x1xi32>
    %30 = arith.sitofp %29 : vector<16x1xi32> to vector<16x1xf32>
    %c0_9 = arith.constant 0 : index
    %c0_10 = arith.constant 0 : index
    %c0_11 = arith.constant 0 : index
    %31 = vector.load %arg4[%c0_9, %c0_10, %c0_11] : memref<1x1x1xf32, #tpu.memory_space<vmem>>, vector<1x1x1xf32>
    %32 = vector.shape_cast %25 : vector<16x1xf32> to vector<1x16x1xf32>
    %cst_12 = arith.constant dense<0.000000e+00> : vector<1xf32>
    %33 = vector.multi_reduction <add>, %32, %cst_12 [1, 2] : vector<1x16x1xf32> to vector<1xf32>
    %34 = vector.shape_cast %33 : vector<1xf32> to vector<1x1x1xf32>
    %35 = vector.extract %34[0, 0, 0] : f32 from vector<1x1x1xf32>
    %36 = vector.broadcast %35 : f32 to vector<1x1x1xf32>
    %37 = arith.addf %31, %36 : vector<1x1x1xf32>
    %c0_13 = arith.constant 0 : index
    %c0_14 = arith.constant 0 : index
    %c0_15 = arith.constant 0 : index
    %38 = vector.load %arg4[%c0_13, %c0_14, %c0_15] : memref<1x1x1xf32, #tpu.memory_space<vmem>>, vector<1x1x1xf32>
    tpu.vector_store %arg4[%c0_13, %c0_14, %c0_15], %37 {strides = array<i32>} : memref<1x1x1xf32, #tpu.memory_space<vmem>>, vector<1x1x1xf32>,
    %c0_16 = arith.constant 0 : index
    %c0_17 = arith.constant 0 : index
    %c0_18 = arith.constant 0 : index
    %39 = vector.load %arg5[%c0_16, %c0_17, %c0_18] : memref<1x1x1xf32, #tpu.memory_space<vmem>>, vector<1x1x1xf32>
    %40 = arith.mulf %30, %26 : vector<16x1xf32>
    %41 = vector.shape_cast %40 : vector<16x1xf32> to vector<1x16x1xf32>
    %cst_19 = arith.constant dense<0.000000e+00> : vector<1xf32>
    %42 = vector.multi_reduction <add>, %41, %cst_19 [1, 2] : vector<1x16x1xf32> to vector<1xf32>
    %43 = vector.shape_cast %42 : vector<1xf32> to vector<1x1x1xf32>
    %44 = vector.extract %43[0, 0, 0] : f32 from vector<1x1x1xf32>
    %45 = vector.broadcast %44 : f32 to vector<1x1x1xf32>
    %46 = arith.addf %39, %45 : vector<1x1x1xf32>
    %c0_20 = arith.constant 0 : index
    %c0_21 = arith.constant 0 : index
    %c0_22 = arith.constant 0 : index
    %47 = vector.load %arg5[%c0_20, %c0_21, %c0_22] : memref<1x1x1xf32, #tpu.memory_space<vmem>>, vector<1x1x1xf32>
    tpu.vector_store %arg5[%c0_20, %c0_21, %c0_22], %46 {strides = array<i32>} : memref<1x1x1xf32, #tpu.memory_space<vmem>>, vector<1x1x1xf32>,
    %c0_23 = arith.constant 0 : index
    %c0_24 = arith.constant 0 : index
    %c0_25 = arith.constant 0 : index
    %48 = vector.load %arg6[%c0_23, %c0_24, %c0_25] : memref<1x1x1xf32, #tpu.memory_space<vmem>>, vector<1x1x1xf32>
    %49 = vector.shape_cast %30 : vector<16x1xf32> to vector<1x16x1xf32>
    %cst_26 = arith.constant dense<0.000000e+00> : vector<1xf32>
    %50 = vector.multi_reduction <add>, %49, %cst_26 [1, 2] : vector<1x16x1xf32> to vector<1xf32>
    %51 = vector.shape_cast %50 : vector<1xf32> to vector<1x1x1xf32>
    %52 = vector.extract %51[0, 0, 0] : f32 from vector<1x1x1xf32>
    %53 = vector.broadcast %52 : f32 to vector<1x1x1xf32>
    %54 = arith.addf %48, %53 : vector<1x1x1xf32>
    %c0_27 = arith.constant 0 : index
    %c0_28 = arith.constant 0 : index
    %c0_29 = arith.constant 0 : index
    %55 = vector.load %arg6[%c0_27, %c0_28, %c0_29] : memref<1x1x1xf32, #tpu.memory_space<vmem>>, vector<1x1x1xf32>
    tpu.vector_store %arg6[%c0_27, %c0_28, %c0_29], %54 {strides = array<i32>} : memref<1x1x1xf32, #tpu.memory_space<vmem>>, vector<1x1x1xf32>,
    return
  }
  func.func @transform_0(%arg0: i32, %arg1: i32) -> (i32, i32) {
    %c1_i32 = arith.constant 1 : i32
    %0 = arith.muli %arg0, %c1_i32 : i32
    %1 = arith.addi %0, %arg1 : i32
    %c0_i32 = arith.constant 0 : i32
    %c0_i32_0 = arith.constant 0 : i32
    return %1, %c0_i32 : i32, i32
  }
  func.func @transform_1(%arg0: i32, %arg1: i32) -> (i32, i32) {
    %c1_i32 = arith.constant 1 : i32
    %0 = arith.muli %arg0, %c1_i32 : i32
    %1 = arith.addi %0, %arg1 : i32
    %c0_i32 = arith.constant 0 : i32
    %c0_i32_0 = arith.constant 0 : i32
    return %1, %c0_i32 : i32, i32
  }
  func.func @transform_2(%arg0: i32, %arg1: i32) -> (i32, i32, i32) {
    %c0_i32 = arith.constant 0 : i32
    %c0_i32_0 = arith.constant 0 : i32
    %c0_i32_1 = arith.constant 0 : i32
    return %arg0, %c0_i32, %c0_i32_0 : i32, i32, i32
  }
  func.func @transform_3(%arg0: i32, %arg1: i32) -> (i32, i32, i32) {
    %c0_i32 = arith.constant 0 : i32
    %c0_i32_0 = arith.constant 0 : i32
    %c0_i32_1 = arith.constant 0 : i32
    return %arg0, %c0_i32, %c0_i32_0 : i32, i32, i32
  }
  func.func @transform_4(%arg0: i32, %arg1: i32) -> (i32, i32, i32) {
    %c0_i32 = arith.constant 0 : i32
    %c0_i32_0 = arith.constant 0 : i32
    %c0_i32_1 = arith.constant 0 : i32
    return %arg0, %c0_i32, %c0_i32_0 : i32, i32, i32
  }
}

</mosaic_0001>

<bundles_post_ra>
// kernel: tpu_custom_call.1
= control target key start
LH: loop header
LB: loop body
LE: loop exit
PB: predicated region body
PF: predicated region fallthrough
CT: control target
= control target key end

     0   :  { %10 = vsyncpa [#allocation3], 0  ;;  %vm74_vm0 = vcmask 261120   ;;  %v331_v4 = vmov 0   ;;  %s429_s0 = inlined_call_operand.vmem [shape: f32[16,32], index: 0, kind: input, shape index: {}]   ;;  %s430_s1 = inlined_call_operand.vmem [shape: s32[16,1], index: 1, kind: input, shape index: {}]   ;;  %s431_s2 = inlined_call_operand.hbm [shape: f32[1,1,1], index: 2, kind: output, shape index: {0}]   ;;  %s432_s3 = inlined_call_operand.hbm [shape: f32[1,1,1], index: 3, kind: output, shape index: {1}]   ;;  %s433_s4 = inlined_call_operand.hbm [shape: f32[1,1,1], index: 4, kind: output, shape index: {2}]  }
   0x1   :  { %v68_v0 = vld [vmem:[%s429_s0] sm:$0xff]  ;;  %v69_v1 = vld [vmem:[%s429_s0 + $0x8] sm:$0xff]  ;;  %251 = vset.pattern.permute.xlu1 %v331_v4 }
   0x2   :  { %v70_v2 = vld [vmem:[%s430_s1] sm:$0xff]  ;;  %v75_v3 = vsel %vm74_vm0, %v68_v0, -inf }
   0x3   :  { %11 = vsyncpa [#allocation5], 0  ;;  %252 = vset.pattern.permute.xlu0 %v331_v4  ;;  %82 = vperm.xlu1 %251, %v70_v2   ;;  %v78_v5 = vsel %vm74_vm0, %v69_v1, -inf  ;;  %v71_v6 = vld [vmem:[%s430_s1 + $0x8] sm:$0xff]  ;;  %v72_v11 = vlaneseq  ;;  %v97_v25 = vsel %vm74_vm0, %v68_v0, 0.0  ;;  %v100_v26 = vsel %vm74_vm0, %v69_v1, 0.0 }
   0x4   :  { %76 = vmax.xlane.f32.xlu0 %v75_v3  ;;  %vm127_vm3 = vcmp.ne.s32.totalorder %v70_v2, 4294967196  ;;  %vm128_vm4 = vcmp.ne.s32.totalorder %v71_v6, 4294967196  ;;  %v332_v27 = vmov 0.0   ;;  %vm134_vm5 = vcmask 7168   ;;  %s333_s0 = smov [#allocation2]   ;;  %s334_s24 = smov [#allocation4]  }
   0x5   :  { %v73_v15 = vand.u32 127, %v72_v11  ;;  %v238_v28 = vsel %vm127_vm3, 1.0, %v332_v27  ;;  %v239_v29 = vsel %vm128_vm4, 1.0, %v332_v27  ;;  %vm64_vm6 = vcmask 0   ;;  %s191_s1 = sshll.u32 %s333_s0, 4  ;;  %s201_s25 = sshll.u32 %s334_s24, 4  ;;  %s192_s1 = int_to_ptr.vmem [resolvable:$true] %s191_s1  ;;  %s202_s25 = int_to_ptr.vmem [resolvable:$true] %s201_s25 }
   0x6   :  { %v170_v30 = vsel %vm134_vm5, %v238_v28, 0.0  ;;  %v171_v31 = vsel %vm134_vm5, %v239_v29, 0.0  ;;  %65 = vst.msk [vmem:[#allocation2] sm:$0x1] %vm64_vm6, %v332_v27  ;;  %66 = vst.msk [vmem:[#allocation4] sm:$0x1] %vm64_vm6, %v332_v27  ;;  %p266_p1 = scmp.lt.s32.totalorder %s192_s1, %s192_s1 }
   0x7   :  { %85 = vperm.xlu1 %251, %v71_v6   ;;  %v172_v32 = vadd.f32 %v171_v31, %v170_v30  ;;  %67 = vst.msk [vmem:[#allocation6] sm:$0x1] %vm64_vm6, %v332_v27  ;;  %s261_s27 = scalar_lea.vmem %s192_s1, 16  ;;  %s265_s28 = scalar_lea.vmem %s192_s1, 32 }
   0x8   :  { %79 = vmax.xlane.f32.xlu0 %v78_v5  ;;  %p262_p0 = scmp.ne.s32.totalorder %s192_s1, %s261_s27  ;;  %p267_p2 = scmp.lt.s32.totalorder %s265_s28, %s261_s27 }
   0xa   :  { %p268_p3 = por %p267_p2, %p266_p1 }
   0xc   :  { %p269_p4 = pnand %p268_p3, %p262_p0 }
  0x82   :  { %v83_v14 = vpop.permute.xlu1 %82 }
  0x83   :  { %vm87_vm1 = vcmp.eq.s32.totalorder %v73_v15, %v83_v14 }
  0x84   :  { %v89_v18 = vsel %vm87_vm1, %v68_v0, 0.0 }
  0x85   :  { %v91_v20 = vsel %vm74_vm0, %v89_v18, 0.0 }
  0x86   :  { %v86_v16 = vpop.permute.xlu1 %85 }
  0x87   :  { %vm88_vm2 = vcmp.eq.s32.totalorder %v73_v15, %v86_v16  ;;  %v133_v16 = vld [vmem:[#allocation2] sm:$0x1] }
  0x88   :  { %v90_v22 = vsel %vm88_vm2, %v69_v1, 0.0 }
  0x89   :  { %v94_v24 = vsel %vm74_vm0, %v90_v22, 0.0 }
  0x91   :  { %v77_v7 = vpop.xlane.xlu0 %76 }
  0x92   :  { %v103_v8 = vsub.f32 %v68_v0, %v77_v7 }
  0x94   :  { %v105_v9 = vmul.f32 1.442695, %v103_v8 }
  0x95   :  { %v80_v10 = vpop.xlane.xlu0 %79 }
  0x96   :  { %253 = vpow2.f32 %v105_v9  ;;  %v104_v12 = vsub.f32 %v69_v1, %v80_v10 }
  0x98   :  { %v107_v13 = vmul.f32 1.442695, %v104_v12 }
  0x9a   :  { %255 = vpow2.f32 %v107_v13 }
  0xa0   :  { %v254_v17 = vpop.eup %253 }
  0xa1   :  { %v109_v19 = vsel %vm74_vm0, %v254_v17, 0.0 }
  0xa2   :  { %110 = vadd.xlane.f32.xlu0 %v109_v19  ;;  %v151_v19 = vld [vmem:[#allocation4] sm:$0x1] }
  0xa4   :  { %v256_v21 = vpop.eup %255 }
  0xa5   :  { %v112_v23 = vsel %vm74_vm0, %v256_v21, 0.0 }
  0xa6   :  { %113 = vadd.xlane.f32.xlu1 %v112_v23  ;;  %92 = vadd.xlane.f32.xlu0 %v91_v20 }
  0xaa   :  { %95 = vadd.xlane.f32.xlu0 %v94_v24 }
  0xae   :  { %98 = vadd.xlane.f32.xlu0 %v97_v25 }
  0xb2   :  { %101 = vadd.xlane.f32.xlu0 %v100_v26 }
 0x12f   :  { %v111_v33 = vpop.xlane.xlu0 %110 }
 0x130   :  { %257 = vlog2.f32 %v111_v33 }
 0x133   :  { %v114_v34 = vpop.xlane.xlu1 %113  ;;  %v93_v35 = vpop.xlane.xlu0 %92 }
 0x134   :  { %259 = vlog2.f32 %v114_v34 }
 0x137   :  { %v96_v36 = vpop.xlane.xlu0 %95 }
 0x13a   :  { %v258_v37 = vpop.eup %257 }
 0x13b   :  { %v116_v38 = vmul.f32 0.6931472, %v258_v37  ;;  %v99_v39 = vpop.xlane.xlu0 %98 }
 0x13d   :  { %v119_v40 = vadd.f32 %v116_v38, %v77_v7 }
 0x13e   :  { %v260_v41 = vpop.eup %259 }
 0x13f   :  { %v118_v42 = vmul.f32 0.6931472, %v260_v41  ;;  %v125_v43 = vsub.f32 %v119_v40, %v93_v35  ;;  %v121_v44 = vmul.f32 32.0, %v119_v40  ;;  %v102_v46 = vpop.xlane.xlu0 %101 }
 0x141   :  { %v120_v45 = vadd.f32 %v118_v42, %v80_v10  ;;  %v152_v47 = vmul.f32 %v238_v28, %v125_v43  ;;  %v123_v49 = vsub.f32 %v121_v44, %v99_v39 }
 0x143   :  { %v126_v48 = vsub.f32 %v120_v45, %v96_v36  ;;  %v122_v50 = vmul.f32 32.0, %v120_v45  ;;  %v135_v53 = vsel %vm134_vm5, %v123_v49, 0.0  ;;  %v154_v55 = vsel %vm134_vm5, %v152_v47, 0.0 }
 0x145   :  { %v153_v51 = vmul.f32 %v239_v29, %v126_v48  ;;  %v124_v52 = vsub.f32 %v122_v50, %v102_v46 }
 0x147   :  { %v136_v54 = vsel %vm134_vm5, %v124_v52, 0.0  ;;  %v155_v56 = vsel %vm134_vm5, %v153_v51, 0.0 }
 0x148   :  { %v137_v57 = vadd.f32 %v136_v54, %v135_v53  ;;  %v156_v58 = vadd.f32 %v155_v56, %v154_v55 }
 0x14a   :  { %138 = vadd.xlane.f32.xlu0 %v137_v57 }
 0x14e   :  { %157 = vadd.xlane.f32.xlu0 %v156_v58 }
 0x152   :  { %173 = vadd.xlane.f32.xlu0 %v172_v32 }
 0x1d7   :  { %v139_v59 = vpop.xlane.xlu0 %138 }
 0x1d8   :  { %v140_v60 = vrot.slane %v139_v59, 4 }
 0x1da   :  { %v141_v61 = vadd.f32 %v140_v60, %v139_v59 }
 0x1db   :  { %v158_v62 = vpop.xlane.xlu0 %157 }
 0x1dc   :  { %v142_v63 = vrot.slane %v141_v61, 2  ;;  %v159_v0 = vrot.slane %v158_v62, 4 }
 0x1de   :  { %v160_v1 = vadd.f32 %v159_v0, %v158_v62  ;;  %v143_v2 = vadd.f32 %v142_v63, %v141_v61 }
 0x1df   :  { %v174_v3 = vpop.xlane.xlu0 %173 }
 0x1e0   :  { %v161_v4 = vrot.slane %v160_v1, 2  ;;  %v175_v5 = vrot.slane %v174_v3, 4  ;;  %v144_v6 = vrot.slane %v143_v2, 1 }
 0x1e2   :  { %v176_v7 = vadd.f32 %v175_v5, %v174_v3  ;;  %v145_v8 = vadd.f32 %v144_v6, %v143_v2  ;;  %v162_v9 = vadd.f32 %v161_v4, %v160_v1 }
 0x1e4   :  { %v177_v10 = vrot.slane %v176_v7, 2  ;;  %240 = vpush %v145_v8  ;;  %v163_v11 = vrot.slane %v162_v9, 1 }
 0x1e6   :  { %v178_v12 = vadd.f32 %v177_v10, %v176_v7  ;;  %v164_v13 = vadd.f32 %v163_v11, %v162_v9 }
 0x1e8   :  { %242 = vpush %v164_v13  ;;  %v179_v14 = vrot.slane %v178_v12, 1 }
 0x1ea   :  { %v180_v15 = vadd.f32 %v179_v14, %v178_v12 }
 0x1ec   :  { %244 = vpush %v180_v15 }
 0x215   :  { %s241_s23 = spop %240 }
 0x216   :  { %v147_v17 = vstv %s241_s23 }
 0x217   :  { %v148_v18 = vadd.f32 %v147_v17, %v133_v16 }
 0x219   :  { %150 = vst.msk [vmem:[#allocation2] sm:$0x1] %vm64_vm6, %v148_v18  ;;  %s243_s26 = spop %242 }
 0x21a   :  { %v166_v20 = vstv %s243_s26 }
 0x21b   :  { %272 = shalt.err (!%p269_p4)
}
 0x21c   :  { %s273_s5 = scalar_lea.hbm %s431_s2, 16 }
 0x21d   :  { %p274_p5 = scmp.ne.s32.totalorder %s431_s2, %s273_s5  ;;  %p277_p6 = scmp.lt.u32.totalorder %s273_s5, %s431_s2 }
 0x21f   :  { %p279_p7 = pnand %p277_p6, %p274_p5 }
 0x221   :  { %282 = shalt.err (!%p279_p7)
}
 0x222   :  { %194 = dma.vmem_to_hbm [thread:$0]  %s192_s1, 16, %s431_s2, [#allocation3]   ;;  %v167_v21 = vadd.f32 %v166_v20, %v151_v19  ;;  %v169_v22 = vld [vmem:[#allocation6] sm:$0x1] }
 0x223   :  { %s335_s12 = smov [#allocation6]   ;;  %s245_s14 = spop %244 }
 0x224   :  { %s211_s13 = sshll.u32 %s335_s12, 4  ;;  %168 = vst.msk [vmem:[#allocation4] sm:$0x1] %vm64_vm6, %v167_v21  ;;  %v182_v23 = vstv %s245_s14  ;;  %s283_s15 = scalar_lea.vmem %s202_s25, 16  ;;  %s212_s13 = int_to_ptr.vmem [resolvable:$true] %s211_s13 }
 0x225   :  { %p284_p8 = scmp.ne.s32.totalorder %s202_s25, %s283_s15  ;;  %s287_s16 = scalar_lea.vmem %s202_s25, 32 }
 0x226   :  { %p288_p9 = scmp.lt.s32.totalorder %s202_s25, %s202_s25  ;;  %p289_p10 = scmp.lt.s32.totalorder %s287_s16, %s283_s15 }
 0x228   :  { %p290_p11 = por %p289_p10, %p288_p9 }
 0x22a   :  { %p291_p12 = pnand %p290_p11, %p284_p8 }
 0x22c   :  { %294 = shalt.err (!%p291_p12)
}
 0x22d   :  { %s295_s2 = scalar_lea.hbm %s432_s3, 16 }
 0x22e   :  { %p296_p13 = scmp.ne.s32.totalorder %s432_s3, %s295_s2  ;;  %p299_p0 = scmp.lt.u32.totalorder %s295_s2, %s432_s3 }
 0x230   :  { %p301_p1 = pnand %p299_p0, %p296_p13 }
 0x232   :  { %304 = shalt.err (!%p301_p1)
}
 0x233   :  { %204 = dma.vmem_to_hbm [thread:$0]  %s202_s25, 16, %s432_s3, [#allocation5]   ;;  %v183_v24 = vadd.f32 %v182_v23, %v169_v22 }
 0x234   :  { %s305_s23 = scalar_lea.vmem %s212_s13, 16  ;;  %s309_s24 = scalar_lea.vmem %s212_s13, 32 }
 0x235   :  { %184 = vst.msk [vmem:[#allocation6] sm:$0x1] %vm64_vm6, %v183_v24  ;;  %p306_p2 = scmp.ne.s32.totalorder %s212_s13, %s305_s23  ;;  %p310_p3 = scmp.lt.s32.totalorder %s212_s13, %s212_s13 }
 0x236   :  { %p311_p4 = scmp.lt.s32.totalorder %s309_s24, %s305_s23 }
 0x238   :  { %p312_p5 = por %p311_p4, %p310_p3 }
 0x23a   :  { %p313_p6 = pnand %p312_p5, %p306_p2 }
 0x23c   :  { %316 = shalt.err (!%p313_p6)
}
 0x23d   :  { %s317_s28 = scalar_lea.hbm %s433_s4, 16 }
 0x23e   :  { %p318_p7 = scmp.ne.s32.totalorder %s433_s4, %s317_s28  ;;  %p321_p8 = scmp.lt.u32.totalorder %s317_s28, %s433_s4 }
 0x240   :  { %p323_p9 = pnand %p321_p8, %p318_p7 }
 0x242   :  { %326 = shalt.err (!%p323_p9)
}
 0x243   :  { %214 = dma.vmem_to_hbm [thread:$0]  %s212_s13, 16, %s433_s4, [#allocation5]  }
 0x244   :  { %327 = dma.done.wait [#allocation3], 16  }
 0x245   :  { %328 = vsyncadd [#allocation3], 4294967280 }
 0x246   :  { %329 = dma.done.wait [#allocation5], 32  }
 0x247   :  { %330 = vsyncadd [#allocation5], 4294967264 }
 0x248   :  { %224 = vsyncpa [#allocation3], 1 }
 0x249   :  { %225 = vsyncpa [#allocation5], 1 }

</bundles_post_ra>
